<compile_context>
chip_gen: v6e
topology: v6e:2x2x1
jax: 0.10.0
libtpu: 0.0.40
codegen_flags: <defaults>
</compile_context>

<pallas_src>
import jax
import jax.numpy as jnp
from jax.experimental import pallas as pl
from jax.experimental.pallas import tpu as pltpu


def _circle_loss_kernel(yl_ref, yt_ref, out_ref):
    yl = yl_ref[...].astype(jnp.float32)      # (tb, C)  logits (f32 or bf16 in)

    # Widen the labels ONCE into the f32 (8,128) layout and do a single
    # compare; every subsequent select reuses this one mask (no per-use int8
    # pack/unpack, no second compare / logical_not on the VALU-bound path).
    pos_mask = yt_ref[...].astype(jnp.float32) != 0.0   # labels strictly {0,1}

    # Single exponent stream: yl for negatives, -yl for positives.
    z = jnp.where(pos_mask, -yl, yl)

    # Per-row, per-branch stabilization: log(1 + sum(exp(z))) =
    #   m + log(exp(-m) + sum(exp(z - m)))  with m = max(0, max(z_masked)).
    neg_inf = jnp.float32(-jnp.inf)
    m_pos = jnp.maximum(
        jnp.max(jnp.where(pos_mask, z, neg_inf), axis=-1, keepdims=True), 0.0)
    m_neg = jnp.maximum(
        jnp.max(jnp.where(pos_mask, neg_inf, z), axis=-1, keepdims=True), 0.0)

    # Per-element blend of the two row maxima so one exp covers both branches;
    # z - shift <= 0 everywhere, so e <= 1 (no overflow, selects stay safe).
    shift = jnp.where(pos_mask, m_pos, m_neg)     # (tb, C)
    e = jnp.exp(z - shift)                        # single EUP exp per element

    # One masked sum + one plain sum; neg_sum = total - pos (labels are {0,1},
    # so the two branches are disjoint and exhaustive).
    pos_sum = jnp.sum(jnp.where(pos_mask, e, 0.0), axis=-1, keepdims=True)
    total_sum = jnp.sum(e, axis=-1, keepdims=True)
    neg_sum = total_sum - pos_sum                                   # (tb, 1)

    neg_term = m_neg + jnp.log(jnp.exp(-m_neg) + neg_sum)
    pos_term = m_pos + jnp.log(jnp.exp(-m_pos) + pos_sum)

    # (tb, 1) column output; output bytes are tiny (4 B/row) so the masked
    # store epilogue is negligible -- kept 2-D for layout safety.
    out_ref[...] = (neg_term + pos_term).astype(out_ref.dtype)


def _vmem_limits():
    """Generation-aware (limit, tile_budget) in bytes.

    ~48 MiB scoped limit on v7x (64 MiB physical), up to 96 MiB on v5e/v6e
    (128 MiB physical); tile budget ~40% of physical so two double-buffered
    inputs plus compiler scratch stay comfortably inside the limit.
    """
    try:
        cap = int(pltpu.get_tpu_info().vmem_capacity_bytes)
    except Exception:
        cap = 64 * 1024 * 1024            # conservative fallback (v7x physical)
    limit = min(cap * 3 // 4, 96 * 1024 * 1024)
    budget = cap * 2 // 5
    return limit, budget


def _pick_tile_b(B, C, logit_bytes, label_bytes, vmem_budget_bytes):
    """Largest batch tile that (a) fits the double-buffered VMEM budget,
    (b) keeps int8 label tiling happy (multiple of 32), and (c) leaves the
    grid with >= 2 steps when B > 32 so both v7x TensorCores get work
    (v5e/v6e are single-TC, so this costs nothing there)."""
    if B <= 32:
        return B                          # one block == full dims (always legal)
    per_row = (logit_bytes + label_bytes) * C + 4        # +4: f32 row-loss out
    cap = vmem_budget_bytes // (2 * per_row)             # 2 pipeline buffers
    half = max(32, ((B + 1) // 2) // 32 * 32)            # force >= 2 grid steps
    limit = max(32, min(cap, half))
    for cand in (4096, 2048, 1024, 512, 256, 128, 64, 32):
        if cand <= limit:
            return cand
    # TODO(synk): for very large C where even 32 rows exceed the budget, add a
    # second "arbitrary" grid axis over C with running max/sum scratch.
    return 32


def multilabel_circle_loss(y_logit, y, *, tile_b=None, bf16_logits=False):
    """y_logit: (B, C) float; y: (B, C) labels in {0, 1}. Returns scalar f32.

    bf16_logits=True feeds the logits to the kernel as bf16 (the kernel still
    computes in f32): -40% HBM traffic on the memory-bound v5e/v6e path.
    """
    B, C = y_logit.shape
    assert y.shape == (B, C)

    if bf16_logits and y_logit.dtype == jnp.float32:
        y_logit = y_logit.astype(jnp.bfloat16)

    vmem_limit, vmem_budget = _vmem_limits()
    if tile_b is None:
        tile_b = _pick_tile_b(
            B, C,
            jnp.dtype(y_logit.dtype).itemsize,
            jnp.dtype(y.dtype).itemsize,
            vmem_budget,
        )

    num_tiles = pl.cdiv(B, tile_b)
    B_pad = num_tiles * tile_b
    if B_pad != B:
        # Pad the batch to a tile multiple (padded rows: logits=0, labels=0 ->
        # finite loss); they are sliced off before the mean.
        y_logit = jnp.pad(y_logit, ((0, B_pad - B), (0, 0)))
        y = jnp.pad(y, ((0, B_pad - B), (0, 0)))

    per_row_loss = pl.pallas_call(
        _circle_loss_kernel,
        out_shape=jax.ShapeDtypeStruct((B_pad, 1), jnp.float32),
        grid_spec=pltpu.PrefetchScalarGridSpec(
            num_scalar_prefetch=0,
            grid=(num_tiles,),
            in_specs=[
                pl.BlockSpec((tile_b, C), lambda i: (i, 0)),
                pl.BlockSpec((tile_b, C), lambda i: (i, 0)),
            ],
            out_specs=pl.BlockSpec((tile_b, 1), lambda i: (i, 0)),
        ),
        compiler_params=pltpu.CompilerParams(
            # Per-tile partial outputs -> fully independent batch axis; this
            # shards across the 2 TensorCores on v7x (v5e/v6e are 1 TC/chip).
            dimension_semantics=("parallel",),
            vmem_limit_bytes=vmem_limit,
        ),
    )(y_logit, y)

    # Mean over the real batch rows outside the kernel (single cheap reduce).
    return jnp.mean(per_row_loss[:B, 0])


def _reference(y_logit, y):
    """Pure-JAX mirror of the PyTorch loop semantics (unstabilized)."""
    yl = y_logit.astype(jnp.float32)
    neg_sum = jnp.sum(jnp.where(y == 0, jnp.exp(yl), 0.0), axis=-1)
    pos_sum = jnp.sum(jnp.where(y == 1, jnp.exp(-yl), 0.0), axis=-1)
    return jnp.mean(jnp.log(1.0 + neg_sum) + jnp.log(1.0 + pos_sum))


def _reference_stable(y_logit, y):
    """Numerically stable reference (logsumexp with an appended 0)."""
    yl = y_logit.astype(jnp.float32)
    neg = jnp.where(y == 0, yl, -jnp.inf)
    pos = jnp.where(y == 1, -yl, -jnp.inf)
    zero = jnp.zeros((yl.shape[0], 1), jnp.float32)
    neg_t = jax.nn.logsumexp(jnp.concatenate([zero, neg], axis=-1), axis=-1)
    pos_t = jax.nn.logsumexp(jnp.concatenate([zero, pos], axis=-1), axis=-1)
    return jnp.mean(neg_t + pos_t)


if __name__ == "__main__":
    key = jax.random.PRNGKey(0)
    k_logit, k_label = jax.random.split(key)

    B, C = 8, 128
    y_logit = jax.random.normal(k_logit, (B, C), dtype=jnp.float32)
    # Labels as int8: pure mask data, 4x fewer HBM bytes than float32.
    y = jax.random.bernoulli(k_label, 0.3, (B, C)).astype(jnp.int8)

    # Moderate logits: match the direct (unstabilized) PyTorch-style reference.
    loss = jax.block_until_ready(multilabel_circle_loss(y_logit, y))
    ref = _reference(y_logit, y)
    assert jnp.allclose(loss, ref, rtol=1e-5, atol=1e-5), (loss, ref)

    # Large logits: stabilized kernel must stay finite and match a logsumexp
    # reference (the naive formula would overflow).
    y_logit_big = y_logit * 100.0
    loss_big = jax.block_until_ready(multilabel_circle_loss(y_logit_big, y))
    ref_big = _reference_stable(y_logit_big, y)
    assert jnp.isfinite(loss_big), loss_big
    assert jnp.allclose(loss_big, ref_big, rtol=1e-5, atol=1e-4), (loss_big, ref_big)

    # bf16-logit bandwidth path (v5e/v6e): same result within bf16 tolerance.
    loss_bf16 = jax.block_until_ready(
        multilabel_circle_loss(y_logit, y, bf16_logits=True))
    assert jnp.allclose(loss_bf16, ref, rtol=3e-2, atol=3e-2), (loss_bf16, ref)

    # Non-divisible batch + multi-step grid: exercises padding and the
    # >= 2-step (two-TensorCore-friendly) path.
    B2 = 40
    y_logit2 = jax.random.normal(jax.random.PRNGKey(1), (B2, C), dtype=jnp.float32)
    y2 = jax.random.bernoulli(jax.random.PRNGKey(2), 0.3, (B2, C)).astype(jnp.int8)
    loss2 = jax.block_until_ready(multilabel_circle_loss(y_logit2, y2, tile_b=32))
    ref2 = _reference(y_logit2, y2)
    assert jnp.allclose(loss2, ref2, rtol=1e-5, atol=1e-5), (loss2, ref2)

    print("KERNEL_OK")
</pallas_src>

<mosaic_0001>
module attributes {stable_mosaic.version = 11 : i64} {
  func.func @_circle_loss_kernel(%arg0: i32, %arg1: memref<8x128xf32, #tpu.memory_space<vmem>>, %arg2: memref<8x128xi8, #tpu.memory_space<vmem>>, %arg3: memref<8x1xf32, #tpu.memory_space<vmem>>) attributes {dimension_semantics = [#tpu.dimension_semantics<parallel>], iteration_bounds = array<i64: 1>, scalar_prefetch = 0 : i64, scratch_operands = 0 : i64, tpu.core_type = #tpu.core_type<tc>, window_params = [{transform_indices = @transform_0, window_bounds = array<i64: 8, 128>}, {transform_indices = @transform_1, window_bounds = array<i64: 8, 128>}, {transform_indices = @transform_2, window_bounds = array<i64: 8, 1>}]} {
    %c0 = arith.constant 0 : index
    %c0_0 = arith.constant 0 : index
    %0 = vector.load %arg1[%c0, %c0_0] : memref<8x128xf32, #tpu.memory_space<vmem>>, vector<8x128xf32>
    %c0_1 = arith.constant 0 : index
    %c0_2 = arith.constant 0 : index
    %1 = vector.load %arg2[%c0_1, %c0_2] : memref<8x128xi8, #tpu.memory_space<vmem>>, vector<8x128xi8>
    %2 = arith.sitofp %1 : vector<8x128xi8> to vector<8x128xf32>
    %cst = arith.constant 0.000000e+00 : f32
    %3 = vector.broadcast %cst : f32 to vector<8x128xf32>
    %4 = arith.cmpf one, %2, %3 : vector<8x128xf32>
    %cst_3 = arith.constant 0.000000e+00 : f32
    %5 = vector.broadcast %cst_3 : f32 to vector<8x128xf32>
    %6 = arith.subf %5, %0 : vector<8x128xf32>
    %7 = arith.select %4, %6, %0 : vector<8x128xi1>, vector<8x128xf32>
    %cst_4 = arith.constant 0xFF800000 : f32
    %8 = vector.broadcast %cst_4 : f32 to vector<8x128xf32>
    %9 = arith.select %4, %7, %8 : vector<8x128xi1>, vector<8x128xf32>
    %cst_5 = arith.constant dense<0xFF800000> : vector<8xf32>
    %10 = vector.multi_reduction <maximumf>, %9, %cst_5 [1] : vector<8x128xf32> to vector<8xf32>
    %11 = vector.shape_cast %10 : vector<8xf32> to vector<8x1xf32>
    %cst_6 = arith.constant 0.000000e+00 : f32
    %12 = vector.broadcast %cst_6 : f32 to vector<8x1xf32>
    %13 = arith.maximumf %11, %12 : vector<8x1xf32>
    %cst_7 = arith.constant 0xFF800000 : f32
    %14 = vector.broadcast %cst_7 : f32 to vector<8x128xf32>
    %15 = arith.select %4, %14, %7 : vector<8x128xi1>, vector<8x128xf32>
    %cst_8 = arith.constant dense<0xFF800000> : vector<8xf32>
    %16 = vector.multi_reduction <maximumf>, %15, %cst_8 [1] : vector<8x128xf32> to vector<8xf32>
    %17 = vector.shape_cast %16 : vector<8xf32> to vector<8x1xf32>
    %cst_9 = arith.constant 0.000000e+00 : f32
    %18 = vector.broadcast %cst_9 : f32 to vector<8x1xf32>
    %19 = arith.maximumf %17, %18 : vector<8x1xf32>
    %20 = vector.shape_cast %13 : vector<8x1xf32> to vector<8x1xf32>
    %21 = vector.broadcast %20 : vector<8x1xf32> to vector<8x128xf32>
    %22 = vector.shape_cast %19 : vector<8x1xf32> to vector<8x1xf32>
    %23 = vector.broadcast %22 : vector<8x1xf32> to vector<8x128xf32>
    %24 = arith.select %4, %21, %23 : vector<8x128xi1>, vector<8x128xf32>
    %25 = arith.subf %7, %24 : vector<8x128xf32>
    %26 = math.exp %25 : vector<8x128xf32>
    %cst_10 = arith.constant 0.000000e+00 : f32
    %27 = vector.broadcast %cst_10 : f32 to vector<8x128xf32>
    %28 = arith.select %4, %26, %27 : vector<8x128xi1>, vector<8x128xf32>
    %cst_11 = arith.constant dense<0.000000e+00> : vector<8xf32>
    %29 = vector.multi_reduction <add>, %28, %cst_11 [1] : vector<8x128xf32> to vector<8xf32>
    %30 = vector.shape_cast %29 : vector<8xf32> to vector<8x1xf32>
    %cst_12 = arith.constant dense<0.000000e+00> : vector<8xf32>
    %31 = vector.multi_reduction <add>, %26, %cst_12 [1] : vector<8x128xf32> to vector<8xf32>
    %32 = vector.shape_cast %31 : vector<8xf32> to vector<8x1xf32>
    %33 = arith.subf %32, %30 : vector<8x1xf32>
    %cst_13 = arith.constant 0.000000e+00 : f32
    %34 = vector.broadcast %cst_13 : f32 to vector<8x1xf32>
    %35 = arith.subf %34, %19 : vector<8x1xf32>
    %36 = math.exp %35 : vector<8x1xf32>
    %37 = arith.addf %36, %33 : vector<8x1xf32>
    %38 = math.log %37 : vector<8x1xf32>
    %39 = arith.addf %19, %38 : vector<8x1xf32>
    %cst_14 = arith.constant 0.000000e+00 : f32
    %40 = vector.broadcast %cst_14 : f32 to vector<8x1xf32>
    %41 = arith.subf %40, %13 : vector<8x1xf32>
    %42 = math.exp %41 : vector<8x1xf32>
    %43 = arith.addf %42, %30 : vector<8x1xf32>
    %44 = math.log %43 : vector<8x1xf32>
    %45 = arith.addf %13, %44 : vector<8x1xf32>
    %46 = arith.addf %39, %45 : vector<8x1xf32>
    %c0_15 = arith.constant 0 : index
    %c0_16 = arith.constant 0 : index
    %47 = vector.load %arg3[%c0_15, %c0_16] : memref<8x1xf32, #tpu.memory_space<vmem>>, vector<8x1xf32>
    tpu.vector_store %arg3[%c0_15, %c0_16], %46 {strides = array<i32>} : memref<8x1xf32, #tpu.memory_space<vmem>>, vector<8x1xf32>,
    return
  }
  func.func @transform_0(%arg0: i32) -> (i32, i32) {
    %c0_i32 = arith.constant 0 : i32
    %c0_i32_0 = arith.constant 0 : i32
    return %arg0, %c0_i32 : i32, i32
  }
  func.func @transform_1(%arg0: i32) -> (i32, i32) {
    %c0_i32 = arith.constant 0 : i32
    %c0_i32_0 = arith.constant 0 : i32
    return %arg0, %c0_i32 : i32, i32
  }
  func.func @transform_2(%arg0: i32) -> (i32, i32) {
    %c0_i32 = arith.constant 0 : i32
    %c0_i32_0 = arith.constant 0 : i32
    return %arg0, %c0_i32 : i32, i32
  }
}

</mosaic_0001>

<bundles_post_ra>
// kernel: tpu_custom_call.1
= control target key start
LH: loop header
LB: loop body
LE: loop exit
PB: predicated region body
PF: predicated region fallthrough
CT: control target
= control target key end

     0   :  { %7 = vsyncpa [#allocation3], 0  ;;  %s165_s0 = inlined_call_operand.hbm [shape: f32[8,128], index: 0, kind: input, shape index: {}]   ;;  %s166_s1 = inlined_call_operand.hbm [shape: s8[8,128], index: 1, kind: input, shape index: {}]   ;;  %s167_s2 = inlined_call_operand.vmem [shape: f32[8,1], index: 2, kind: output, shape index: {}]  }
   0x1   :  { %8 = vsyncpa [#allocation5], 0  ;;  %s139_s9 = smov [#allocation2]   ;;  %s140_s11 = smov [#allocation4]  }
   0x2   :  { %s15_s10 = sshll.u32 %s139_s9, 4  ;;  %s25_s12 = sshll.u32 %s140_s11, 4  ;;  %s16_s10 = int_to_ptr.vmem [resolvable:$true] %s15_s10  ;;  %s26_s12 = int_to_ptr.vmem [resolvable:$true] %s25_s12 }
   0x3   :  { %s103_s13 = scalar_lea.vmem %s16_s10, 128  ;;  %p108_p1 = scmp.lt.s32.totalorder %s16_s10, %s16_s10 }
   0x4   :  { %p104_p0 = scmp.ne.s32.totalorder %s16_s10, %s103_s13  ;;  %p109_p2 = scmp.lt.s32.totalorder %s103_s13, %s103_s13 }
   0x6   :  { %p110_p3 = por %p109_p2, %p108_p1 }
   0x8   :  { %p111_p4 = pnand %p110_p3, %p104_p0 }
   0xa   :  { %114 = shalt.err (!%p111_p4)
}
   0xb   :  { %18 = dma.hbm_to_vmem [thread:$0]  %s165_s0, 128, %s16_s10, [#allocation3]  }
   0xc   :  { %s123_s16 = scalar_lea.vmem %s26_s12, 32  ;;  %p128_p6 = scmp.lt.s32.totalorder %s26_s12, %s26_s12 }
   0xd   :  { %p124_p5 = scmp.ne.s32.totalorder %s26_s12, %s123_s16  ;;  %p129_p7 = scmp.lt.s32.totalorder %s123_s16, %s123_s16 }
   0xf   :  { %p130_p8 = por %p129_p7, %p128_p6 }
  0x11   :  { %p131_p9 = pnand %p130_p8, %p124_p5 }
  0x13   :  { %134 = shalt.err (!%p131_p9)
}
  0x14   :  { %28 = dma.hbm_to_vmem [thread:$0]  %s166_s1, 32, %s26_s12, [#allocation5]  }
  0x15   :  { %135 = dma.done.wait [#allocation3], 128  }
  0x16   :  { %136 = vsyncadd [#allocation3], 4294967168 }
  0x17   :  { %137 = dma.done.wait [#allocation5], 32  }
  0x18   :  { %138 = vsyncadd [#allocation5], 4294967264  ;;  %v35_v0 = vld [vmem:[#allocation2] sm:$0xff]  ;;  %v36_v1 = vld [vmem:[#allocation4] sm:$0x3]  ;;  %vm75_vm1 = vcmask 7168  }
  0x19   :  { %v37_v2 = vunpack.c.0.s8 %v36_v1  ;;  %v40_v3 = vsub.f32 0.0, %v35_v0 }
  0x1b   :  { %v38_v4 = vcvt.s32.f32 %v37_v2 }
  0x1d   :  { %vm39_vm0 = vcmp.ne.f32.partialorder %v38_v4, 0.0 }
  0x1e   :  { %v42_v5 = vsel %vm39_vm0, %v40_v3, -inf  ;;  %v46_v6 = vsel %vm39_vm0, -inf, %v35_v0  ;;  %v41_v7 = vsel %vm39_vm0, %v40_v3, %v35_v0 }
  0x1f   :  { %43 = vmax.xlane.f32.xlu0 %v42_v5 }
  0x23   :  { %47 = vmax.xlane.f32.xlu0 %v46_v6 }
  0xa8   :  { %v44_v8 = vpop.xlane.xlu0 %43 }
  0xa9   :  { %v45_v10 = vmax.f32 %v44_v8, 0.0 }
  0xab   :  { %v67_v17 = vsub.f32 0.0, %v45_v10 }
  0xac   :  { %v48_v9 = vpop.xlane.xlu0 %47 }
  0xad   :  { %v49_v11 = vmax.f32 %v48_v9, 0.0  ;;  %v68_v18 = vmul.f32 1.442695, %v67_v17 }
  0xaf   :  { %v50_v12 = vsel %vm39_vm0, %v45_v10, %v49_v11  ;;  %v60_v19 = vsub.f32 0.0, %v49_v11 }
  0xb0   :  { %v51_v13 = vsub.f32 %v41_v7, %v50_v12 }
  0xb1   :  { %v61_v20 = vmul.f32 1.442695, %v60_v19 }
  0xb2   :  { %v52_v14 = vmul.f32 1.442695, %v51_v13 }
  0xb4   :  { %85 = vpow2.f32 %v52_v14 }
  0xb5   :  { %87 = vpow2.f32 %v68_v18 }
  0xb6   :  { %89 = vpow2.f32 %v61_v20 }
  0xc1   :  { %v86_v15 = vpop.eup %85 }
  0xc2   :  { %v54_v16 = vsel %vm39_vm0, %v86_v15, 0.0  ;;  %v88_v21 = vpop.eup %87 }
  0xc3   :  { %55 = vadd.xlane.f32.xlu1 %v54_v16  ;;  %v90_v26 = vpop.eup %89 }
  0xc7   :  { %57 = vadd.xlane.f32.xlu1 %v86_v15 }
 0x14c   :  { %v56_v22 = vpop.xlane.xlu1 %55 }
 0x14d   :  { %v70_v23 = vadd.f32 %v88_v21, %v56_v22 }
 0x14f   :  { %91 = vlog2.f32 %v70_v23 }
 0x150   :  { %v58_v24 = vpop.xlane.xlu1 %57 }
 0x151   :  { %v59_v25 = vsub.f32 %v58_v24, %v56_v22 }
 0x153   :  { %v63_v27 = vadd.f32 %v90_v26, %v59_v25 }
 0x155   :  { %93 = vlog2.f32 %v63_v27 }
 0x15c   :  { %v92_v28 = vpop.eup %91 }
 0x15d   :  { %v72_v29 = vmul.f32 0.6931472, %v92_v28 }
 0x15f   :  { %v73_v32 = vadd.f32 %v72_v29, %v45_v10 }
 0x162   :  { %v94_v30 = vpop.eup %93 }
 0x163   :  { %v65_v31 = vmul.f32 0.6931472, %v94_v30 }
 0x165   :  { %v66_v33 = vadd.f32 %v65_v31, %v49_v11 }
 0x167   :  { %v74_v34 = vadd.f32 %v73_v32, %v66_v33 }
 0x169   :  { %76 = vst.msk [vmem:[%s167_s2] sm:$0xff] %vm75_vm1, %v74_v34 }
 0x16a   :  { %81 = vsyncpa [#allocation3], 1 }
 0x16b   :  { %82 = vsyncpa [#allocation5], 1 }

</bundles_post_ra>
